<compile_context>
chip_gen: v5e
topology: v5e:2x2
jax: 0.10.0
libtpu: 0.0.40
codegen_flags: <defaults>
</compile_context>

<pallas_src>
import jax
import jax.numpy as jnp
from jax.experimental import pallas as pl
from jax.experimental.pallas import tpu as pltpu

_MIB = 1024 * 1024


def _nconv_kernel(x_ref, a_ref, o_ref, acc_ref):
    """One grid step: a TB-deep batch of (F,TN)@(TN,V) matmuls, accumulated in
    f32 over the (optional) N-contraction grid axis."""
    @pl.when(pl.program_id(1) == 0)
    def _():
        acc_ref[...] = jnp.zeros_like(acc_ref)

    # Batched matmul over the leading (b*m) tile; f32 accumulation on the MXU.
    acc_ref[...] += jnp.einsum(
        "bfn,bnv->bfv",
        x_ref[...],
        a_ref[...],
        preferred_element_type=jnp.float32,
    )

    @pl.when(pl.program_id(1) == pl.num_programs(1) - 1)
    def _():
        o_ref[...] = acc_ref[...].astype(o_ref.dtype)


def _vmem_capacity_bytes():
    """Physical VMEM per TensorCore; conservative (v7x) fallback off-device."""
    try:
        return int(pltpu.get_tpu_info().vmem_capacity_bytes)
    except Exception:  # noqa: BLE001 — assume the tightest generation (v7x).
        return 64 * _MIB


def _largest_divisor_leq(n, cap):
    cap = max(1, min(cap, n))
    for d in range(cap, 0, -1):
        if n % d == 0:
            return d
    return 1


def _choose_tiling(BM, F, N, V, in_itemsize, out_itemsize, budget):
    """Pick (TB, TN): the (b*m) batch tile and the N contraction tile, sized
    against the per-generation VMEM budget."""

    def step_bytes(tb, tn):
        # x + A tiles (double-buffered), out tile (double-buffered), f32 acc.
        return (2 * tb * (F * tn + tn * V) * in_itemsize
                + 2 * tb * F * V * out_itemsize
                + tb * F * V * 4)

    tn = N
    if step_bytes(1, tn) > budget:
        # Even a single (b,m) row at full N overflows the budget: split the
        # contraction.  TN must be a multiple of 128 (lane rule on the x
        # block's last dim) and must divide N exactly so no out-of-bounds
        # garbage enters the accumulation.
        for cand in range((N // 128) * 128, 0, -128):
            if N % cand == 0 and step_bytes(1, cand) <= budget:
                tn = cand
                break
        # TODO(synk): mask the ragged final N block in-kernel to support huge
        # node counts that have no 128-multiple divisor.

    # >= 8 grid steps on the parallel axis (>= 4 per core on v7x's 2 TCs).
    min_steps = 8 if BM >= 8 else BM
    tb_cap = max(1, budget // step_bytes(1, tn))
    tb_target = max(1, min(tb_cap, BM, max(1, BM // min_steps)))
    # Prefer an exact divisor of B*M (no ragged final block); only fall back
    # to the budgeted, non-dividing TB when the best divisor loses > 2x.
    tb_div = _largest_divisor_leq(BM, tb_target)
    tb = tb_div if 2 * tb_div >= tb_target else tb_target
    return tb, tn, step_bytes(tb, tn)


def nconv(x, A, *, compute_dtype=None):
    """Pallas TPU forward of torch.einsum('bfnm,bmnv->bfvm', x, A).

    x : (B, F, N, M)   (batch, features, nodes, time)
    A : (B, M, N, V)   (batch, time,    nodes, nodes)
    compute_dtype : optional dtype (e.g. jnp.bfloat16) used for the streamed
        operands; accumulation is always f32 and the output keeps the
        caller's dtype.
    returns (B, F, V, M)
    """
    B, F, N, M = x.shape
    Bb, Mm, Nn, V = A.shape
    assert (B, M, N) == (Bb, Mm, Nn), "x / A shape mismatch"

    out_dtype = jnp.result_type(x.dtype, A.dtype)
    in_dtype = jnp.dtype(compute_dtype) if compute_dtype is not None else jnp.dtype(out_dtype)

    BM = B * M
    # (B,F,N,M) -> (B,M,F,N) -> (BM,F,N).  With allow_input_fusion below this
    # transpose (and cast) can be fused into the custom-call operand instead
    # of being materialized as a separate HBM pass.
    x_bm = jnp.transpose(x, (0, 3, 1, 2)).reshape(BM, F, N).astype(in_dtype)
    # (B,M,N,V) -> (BM,N,V): pure reshape, no data movement.
    a_bm = A.reshape(BM, N, V).astype(in_dtype)

    vmem_cap = _vmem_capacity_bytes()
    budget = (2 * vmem_cap) // 3          # ~42 MiB on v7x, ~85 MiB on v5e/v6e
    TB, TN, used_bytes = _choose_tiling(
        BM, F, N, V,
        jnp.dtype(in_dtype).itemsize, jnp.dtype(out_dtype).itemsize, budget)

    grid = (pl.cdiv(BM, TB), pl.cdiv(N, TN))
    vmem_limit = int(min(int(0.85 * vmem_cap),
                         max(32 * _MIB, used_bytes + 8 * _MIB)))

    out_bm = pl.pallas_call(
        _nconv_kernel,
        out_shape=jax.ShapeDtypeStruct((BM, F, V), out_dtype),
        grid_spec=pltpu.PrefetchScalarGridSpec(
            num_scalar_prefetch=0,
            grid=grid,
            in_specs=[
                pl.BlockSpec((TB, F, TN), lambda i, k: (i, 0, k)),  # x tile
                pl.BlockSpec((TB, TN, V), lambda i, k: (i, k, 0)),  # A tile
            ],
            out_specs=pl.BlockSpec((TB, F, V), lambda i, k: (i, 0, 0)),
            scratch_shapes=[pltpu.VMEM((TB, F, V), jnp.float32)],
        ),
        compiler_params=pltpu.CompilerParams(
            dimension_semantics=("parallel", "arbitrary"),
            vmem_limit_bytes=vmem_limit,
            allow_input_fusion=[True, True],
        ),
    )(x_bm, a_bm)

    # (BM,F,V) -> (B,M,F,V) -> (B,F,V,M): the module's contiguous bfvm output.
    # Kept outside the kernel so in-kernel stores stay lane-dense (V-last).
    return jnp.transpose(out_bm.reshape(B, M, F, V), (0, 2, 3, 1))


if __name__ == "__main__":
    # x: (batch, features, nodes, time), A: (batch, time, nodes, nodes)
    B, F, N, V, M = 2, 4, 8, 8, 16

    key = jax.random.PRNGKey(0)
    kx, ka = jax.random.split(key)
    x = jax.random.normal(kx, (B, F, N, M), dtype=jnp.float32)
    A = jax.random.normal(ka, (B, M, N, V), dtype=jnp.float32)

    # Pure-JAX reference of the PyTorch forward.
    y_ref = jnp.einsum("bfnm,bmnv->bfvm", x, A)

    # Full-precision path (matches the torch module numerically).
    y = jax.jit(nconv)(x, A)
    jax.block_until_ready(y)
    assert y.shape == (B, F, V, M)
    assert y.dtype == x.dtype
    assert jnp.allclose(y, y_ref, atol=1e-5, rtol=1e-5)

    # bf16-streamed path (half the HBM traffic; f32 MXU accumulation).
    y_bf16 = jax.jit(lambda xx, aa: nconv(xx, aa, compute_dtype=jnp.bfloat16))(x, A)
    jax.block_until_ready(y_bf16)
    assert y_bf16.shape == (B, F, V, M)
    assert jnp.allclose(y_bf16, y_ref, atol=5e-2, rtol=5e-2)

    print("KERNEL_OK")
</pallas_src>

<mosaic_0001>
module attributes {stable_mosaic.version = 11 : i64} {
  func.func @_nconv_kernel(%arg0: i32, %arg1: i32, %arg2: memref<4x4x8xf32, #tpu.memory_space<vmem>>, %arg3: memref<4x8x8xf32, #tpu.memory_space<vmem>>, %arg4: memref<4x4x8xf32, #tpu.memory_space<vmem>>, %arg5: memref<4x4x8xf32, #tpu.memory_space<vmem>>) attributes {dimension_semantics = [#tpu.dimension_semantics<parallel>, #tpu.dimension_semantics<arbitrary>], iteration_bounds = array<i64: 8, 1>, scalar_prefetch = 0 : i64, scratch_operands = 1 : i64, tpu.core_type = #tpu.core_type<tc>, window_params = [{transform_indices = @transform_0, window_bounds = array<i64: 4, 4, 8>}, {transform_indices = @transform_1, window_bounds = array<i64: 4, 8, 8>}, {transform_indices = @transform_2, window_bounds = array<i64: 4, 4, 8>}]} {
    %c0_i32 = arith.constant 0 : i32
    %0 = arith.cmpi eq, %arg1, %c0_i32 : i32
    %1 = arith.extui %0 : i1 to i32
    %c0_i32_0 = arith.constant 0 : i32
    %2 = arith.cmpi ne, %1, %c0_i32_0 : i32
    scf.if %2 {
      %cst_14 = arith.constant 0.000000e+00 : f32
      %12 = vector.broadcast %cst_14 : f32 to vector<4x4x8xf32>
      %c0_15 = arith.constant 0 : index
      %c0_16 = arith.constant 0 : index
      %c0_17 = arith.constant 0 : index
      %13 = vector.load %arg5[%c0_15, %c0_16, %c0_17] : memref<4x4x8xf32, #tpu.memory_space<vmem>>, vector<4x4x8xf32>
      tpu.vector_store %arg5[%c0_15, %c0_16, %c0_17], %12 {strides = array<i32>} : memref<4x4x8xf32, #tpu.memory_space<vmem>>, vector<4x4x8xf32>,
    } else {
    }
    %c0 = arith.constant 0 : index
    %c0_1 = arith.constant 0 : index
    %c0_2 = arith.constant 0 : index
    %3 = vector.load %arg5[%c0, %c0_1, %c0_2] : memref<4x4x8xf32, #tpu.memory_space<vmem>>, vector<4x4x8xf32>
    %c0_3 = arith.constant 0 : index
    %c0_4 = arith.constant 0 : index
    %c0_5 = arith.constant 0 : index
    %4 = vector.load %arg2[%c0_3, %c0_4, %c0_5] : memref<4x4x8xf32, #tpu.memory_space<vmem>>, vector<4x4x8xf32>
    %c0_6 = arith.constant 0 : index
    %c0_7 = arith.constant 0 : index
    %c0_8 = arith.constant 0 : index
    %5 = vector.load %arg3[%c0_6, %c0_7, %c0_8] : memref<4x8x8xf32, #tpu.memory_space<vmem>>, vector<4x8x8xf32>
    "tpu.trace_start"() <{level = 10 : i32, message = "bfn,bnv->bfv"}> : () -> ()
    %cst = arith.constant dense<0.000000e+00> : vector<4x4x8xf32>
    %6 = tpu.matmul %4, %5, %cst {dimension_numbers = #tpu.dot_dimension_numbers<[2], [1], [1], [2], [0, 0, 0, 1, 1, 2], [0], [0]>} : vector<4x4x8xf32>, vector<4x8x8xf32>, vector<4x4x8xf32> -> vector<4x4x8xf32>
    "tpu.trace_stop"() : () -> ()
    %7 = arith.addf %3, %6 : vector<4x4x8xf32>
    %c0_9 = arith.constant 0 : index
    %c0_10 = arith.constant 0 : index
    %c0_11 = arith.constant 0 : index
    %8 = vector.load %arg5[%c0_9, %c0_10, %c0_11] : memref<4x4x8xf32, #tpu.memory_space<vmem>>, vector<4x4x8xf32>
    tpu.vector_store %arg5[%c0_9, %c0_10, %c0_11], %7 {strides = array<i32>} : memref<4x4x8xf32, #tpu.memory_space<vmem>>, vector<4x4x8xf32>,
    %c0_i32_12 = arith.constant 0 : i32
    %9 = arith.cmpi eq, %arg1, %c0_i32_12 : i32
    %10 = arith.extui %9 : i1 to i32
    %c0_i32_13 = arith.constant 0 : i32
    %11 = arith.cmpi ne, %10, %c0_i32_13 : i32
    scf.if %11 {
      %c0_14 = arith.constant 0 : index
      %c0_15 = arith.constant 0 : index
      %c0_16 = arith.constant 0 : index
      %12 = vector.load %arg5[%c0_14, %c0_15, %c0_16] : memref<4x4x8xf32, #tpu.memory_space<vmem>>, vector<4x4x8xf32>
      %c0_17 = arith.constant 0 : index
      %c0_18 = arith.constant 0 : index
      %c0_19 = arith.constant 0 : index
      %13 = vector.load %arg4[%c0_17, %c0_18, %c0_19] : memref<4x4x8xf32, #tpu.memory_space<vmem>>, vector<4x4x8xf32>
      tpu.vector_store %arg4[%c0_17, %c0_18, %c0_19], %12 {strides = array<i32>} : memref<4x4x8xf32, #tpu.memory_space<vmem>>, vector<4x4x8xf32>,
    } else {
    }
    return
  }
  func.func @transform_0(%arg0: i32, %arg1: i32) -> (i32, i32, i32) {
    %c0_i32 = arith.constant 0 : i32
    %c0_i32_0 = arith.constant 0 : i32
    return %arg0, %c0_i32, %arg1 : i32, i32, i32
  }
  func.func @transform_1(%arg0: i32, %arg1: i32) -> (i32, i32, i32) {
    %c0_i32 = arith.constant 0 : i32
    %c0_i32_0 = arith.constant 0 : i32
    return %arg0, %arg1, %c0_i32 : i32, i32, i32
  }
  func.func @transform_2(%arg0: i32, %arg1: i32) -> (i32, i32, i32) {
    %c0_i32 = arith.constant 0 : i32
    %c0_i32_0 = arith.constant 0 : i32
    %c0_i32_1 = arith.constant 0 : i32
    return %arg0, %c0_i32, %c0_i32_0 : i32, i32, i32
  }
}

</mosaic_0001>

<bundles_post_ra>
// kernel: nconv.1
= control target key start
LH: loop header
LB: loop body
LE: loop exit
PB: predicated region body
PF: predicated region fallthrough
CT: control target
= control target key end

     0   :  { %s502_s9 = smov 0   ;;  %s504_s10 = smov 0   ;;  %s562_s0 = inlined_call_operand.vmem [shape: f32[32,4,8], index: 0, kind: input, shape index: {}]   ;;  %s563_s1 = inlined_call_operand.vmem [shape: f32[32,8,8], index: 1, kind: input, shape index: {}]   ;;  %s564_s2 = inlined_call_operand.vmem [shape: f32[32,4,8], index: 2, kind: output, shape index: {}]  }
   0x1   :  { %s506_s11 = smov 0  }
   0x2 LB: > { %s24_s12 = sadd.s32 1, %s480_s10  ;;  %p424_p0 = scmp.ge.s32.totalorder %s484_s11, 1  ;;  %s484_s11 = sphi %s506_s11, %s12_s11   ;;  %s480_s10 = sphi %s504_s10, %s566_s10   ;;  %s476_s9 = sphi %s502_s9, %s565_s9  }
   0x3   : > { %p26_p1 = scmp.ge.s32.totalorder %s24_s12, 8  ;;  %p146_p2 = scmp.lt.s32.totalorder %s484_s11, 9 }
   0x5   : > { %s568_s12 = smov (%p26_p1, %s24_s12), 0  ;;  %p147_p3 = pnand %p424_p0, %p146_p2 }
   0x6   : > { %s425_s13 = sshll.u32 (!%p147_p3), %s476_s9, 2 }
   0x7   : > { %150 = sbr.rel (%p147_p3) target bundleno = 161 (0xa1), region = 28  ;;  %p180_p4 = scmp.lt.s32.totalorder (!%p147_p3), %s425_s13, 31 }
   0xc   : > { %vm207_vm0 = vcmask 60416   ;;  %v486_v0 = vmov 0.0   ;;  %s570_s13 = smov (!%p180_p4, %s425_s13), 31  ;;  %vm224_vm1 = vcmask 64512  }
   0xd   : > { %208 = vst.msk [vmem:[#allocation2] sm:$0xf] %vm207_vm0, %v486_v0  ;;  %s428_s14 = sshll.u32 %s570_s13, 3  ;;  %s426_s15 = sshll.u32 %s570_s13, 2 }
   0xe   : > { %209 = vst.msk [vmem:[#allocation2 + $0x4] sm:$0xf] %vm207_vm0, %v486_v0  ;;  %s195_s18 = scalar_lea.vmem %s563_s1, %s428_s14  ;;  %s186_s21 = scalar_lea.vmem %s562_s0, %s426_s15 }
   0xf   : > { %210 = vst.msk [vmem:[#allocation2 + $0x8] sm:$0xf] %vm207_vm0, %v486_v0  ;;  %v222_v1 = vld [vmem:[%s195_s18 + $0x10] sm:$0xff]  ;;  %v223_v2 = vld [vmem:[%s195_s18 + $0x18] sm:$0xff]  ;;  %v218_v3 = vld [vmem:[%s186_s21 + $0x8] sm:$0xf]  ;;  %s201_s24 = scalar_lea.vmem %s564_s2, %s426_s15 }
  0x10   : > { %211 = vst.msk [vmem:[#allocation2 + $0xc] sm:$0xf] %vm207_vm0, %v486_v0  ;;  %289 = vmatpush.msra.mxu2 %v222_v1  ;;  %312 = vmatpush.msra.mxu3 %v223_v2  ;;  %v219_v4 = vld [vmem:[%s186_s21 + $0xc] sm:$0xf]  ;;  %v220_v5 = vld [vmem:[%s195_s18] sm:$0xff] }
  0x11   : > { %v221_v6 = vld [vmem:[%s195_s18 + $0x8] sm:$0xff]  ;;  %433 = vmatmul.msk.f32.vlgmr.msra.gmra.mxu2 %vm224_vm1, %v218_v3  ;;  %434 = vmatmul.msk.f32.vlgmr.msra.gmra.mxu3 %vm224_vm1, %v219_v4  ;;  %v216_v7 = vld [vmem:[%s186_s21] sm:$0xf]  ;;  %v217_v8 = vld [vmem:[%s186_s21 + $0x4] sm:$0xf] }
  0x12   : > { %243 = vmatpush.msra.mxu0 %v220_v5  ;;  %266 = vmatpush.msra.mxu1 %v221_v6 }
  0x13   : > { %431 = vmatmul.msk.f32.vlgmr.msra.gmra.mxu0 %vm224_vm1, %v216_v7  ;;  %432 = vmatmul.msk.f32.vlgmr.msra.gmra.mxu1 %vm224_vm1, %v217_v8 }
  0x14   : > { %v212_v9 = vld [vmem:[#allocation2] sm:$0xf] }
  0x15   : > { %v213_v10 = vld [vmem:[#allocation2 + $0x4] sm:$0xf] }
  0x16   : > { %v214_v15 = vld [vmem:[#allocation2 + $0x8] sm:$0xf] }
  0x17   : > { %v215_v16 = vld [vmem:[#allocation2 + $0xc] sm:$0xf] }
  0x90   : > { %v245_v11 = vpop.f32.mrf.mxu0  ;;  %v268_v12 = vpop.f32.mrf.mxu1 }
  0x91   : > { %v317_v13 = vadd.f32 %v245_v11, %v212_v9  ;;  %v318_v14 = vadd.f32 %v268_v12, %v213_v10 }
  0x93   : > { %322 = vst.msk [vmem:[#allocation2] sm:$0xf] %vm207_vm0, %v317_v13 }
  0x94   : > { %323 = vst.msk [vmem:[#allocation2 + $0x4] sm:$0xf] %vm207_vm0, %v318_v14  ;;  %v291_v17 = vpop.f32.mrf.mxu2  ;;  %v314_v18 = vpop.f32.mrf.mxu3 }
  0x95   : > { %v319_v19 = vadd.f32 %v291_v17, %v214_v15  ;;  %v320_v20 = vadd.f32 %v314_v18, %v215_v16 }
  0x97   : > { %324 = vst.msk [vmem:[#allocation2 + $0x8] sm:$0xf] %vm207_vm0, %v319_v19 }
  0x98   : > { %325 = vst.msk [vmem:[#allocation2 + $0xc] sm:$0xf] %vm207_vm0, %v320_v20 }
  0x9a   : > { %v329_v21 = vld [vmem:[#allocation2] sm:$0xf] }
  0x9b   : > { %333 = vst.msk [vmem:[%s201_s24] sm:$0xf] %vm207_vm0, %v329_v21  ;;  %v330_v22 = vld [vmem:[#allocation2 + $0x4] sm:$0xf] }
  0x9c   : > { %334 = vst.msk [vmem:[%s201_s24 + $0x4] sm:$0xf] %vm207_vm0, %v330_v22 }
  0x9e   : > { %v331_v23 = vld [vmem:[#allocation2 + $0x8] sm:$0xf] }
  0x9f   : > { %335 = vst.msk [vmem:[%s201_s24 + $0x8] sm:$0xf] %vm207_vm0, %v331_v23  ;;  %v332_v24 = vld [vmem:[#allocation2 + $0xc] sm:$0xf] }
  0xa0   : > { %336 = vst.msk [vmem:[%s201_s24 + $0xc] sm:$0xf] %vm207_vm0, %v332_v24 }
  0xa1 PF: > { %s12_s11 = sadd.s32 1, %s484_s11   ;;  %s565_s9 = smov %s480_s10 }
  0xa2   : > { %p9_p5 = scmp.ge.s32.totalorder %s12_s11, 10   ;;  %s566_s10 = smov %s568_s12 }
  0xa4   :  { %11 = sbr.rel (!%p9_p5) target bundleno = 2 (0x2), region = 69 }

</bundles_post_ra>
